<compile_context>
chip_gen: v7x
topology: tpu7x:2x2x1
jax: 0.10.0
libtpu: 0.0.40
codegen_flags: <defaults>
</compile_context>

<pallas_src>
import functools
import math

import jax
import jax.numpy as jnp
from jax.experimental import pallas as pl
from jax.experimental.pallas import tpu as pltpu


def _cdiv(a, b):
    return -(-a // b)


# ----------------------------------------------------------------------------
# Kernel bodies
# ----------------------------------------------------------------------------
def _pos_emb_kernel_split(x_ref, freqs_ref, out_ref, *, half_dim):
    """Used when half_dim % 128 == 0: both slice stores are lane-dense.

    x_ref:     (T, 1)         f32
    freqs_ref: (1, half_dim)  f32   (resident across grid steps)
    out_ref:   (T, 2*half_dim)
    """
    emb = x_ref[...] * freqs_ref[...]                      # (T, half_dim)
    out_ref[:, :half_dim] = jnp.sin(emb).astype(out_ref.dtype)
    out_ref[:, half_dim:] = jnp.cos(emb).astype(out_ref.dtype)


def _pos_emb_kernel_packed(x_ref, fblk_ref, mask_ref, out_ref):
    """Lane-dense packed kernel: r timesteps per output row, width W = r*dim.

    x_ref:    (T, r)  f32   packed timesteps
    fblk_ref: (r, W)  f32   fblk[j, c] = freqs[(c % dim) % half_dim] if c//dim == j else 0
    mask_ref: (1, W)  f32   1.0 on the cos half of each dim-block, else 0.0
    out_ref:  (T, W)
    """
    x = x_ref[...]                                         # (T, r)
    r = x.shape[1]
    # Exact lane expansion of the r timesteps across their dim-wide segments:
    # emb[t, c] = x[t, c // dim] * freqs[...]  (other terms multiply by 0.0).
    emb = x[:, 0:1] * fblk_ref[0:1, :]
    for j in range(1, r):                                  # r is small & static
        emb = emb + x[:, j:j+1] * fblk_ref[j:j+1, :]
    sin_cos = jnp.where(mask_ref[...] == 1.0, jnp.cos(emb), jnp.sin(emb))
    out_ref[...] = sin_cos.astype(out_ref.dtype)           # one dense 128-wide store


# ----------------------------------------------------------------------------
# Wrapper
# ----------------------------------------------------------------------------
def sinusoidal_pos_emb(x, dim, *, tile_rows=1024, out_dtype=jnp.float32):
    """x: (B,) timesteps -> (B, 2*(dim//2)) sinusoidal embedding (== (B, dim) for even dim)."""
    half_dim = dim // 2
    if half_dim < 2:
        raise ValueError("dim must be >= 4: the reference divides by (dim//2 - 1).")
    dim_out = 2 * half_dim            # faithful to torch.cat width (handles odd dim)

    B = int(x.shape[0])
    x = x.astype(jnp.float32).reshape(B)

    emb_scale = math.log(10000.0) / (half_dim - 1)
    freqs = jnp.exp(jnp.arange(half_dim, dtype=jnp.float32) * -emb_scale)

    # ---- kernel variant & lane packing --------------------------------------
    use_split = (half_dim % 128 == 0)           # sin/cos slice stores both lane-dense
    if use_split:
        r = 1
    else:
        r = 128 // math.gcd(dim_out, 128)       # smallest r with (r*dim_out) % 128 == 0
        if r > 16:                              # avoid huge unrolls for awkward dims
            r = 1                               # (falls back to masked stores)
    width = r * dim_out

    # ---- batch tiling --------------------------------------------------------
    rows = _cdiv(B, r)
    # Cap tile so the double-buffered output stays ~16 MiB (safe for v7x 64 MiB VMEM).
    row_bytes = width * jnp.dtype(out_dtype).itemsize
    vmem_rows_cap = max(8, ((8 * 1024 * 1024) // max(row_bytes, 1)) // 8 * 8)
    t_rows = min(tile_rows, rows, vmem_rows_cap)
    if t_rows < rows:
        t_rows = max(8, (t_rows // 8) * 8)      # sublane-aligned tiles when tiling
    n_tiles = _cdiv(rows, t_rows)
    rows_pad = n_tiles * t_rows
    B_pad = rows_pad * r
    if B_pad != B:
        x = jnp.pad(x, (0, B_pad - B))          # padded rows are sliced off below

    out_shape = jax.ShapeDtypeStruct((rows_pad, width), out_dtype)
    out_specs = pl.BlockSpec((t_rows, width), lambda i: (i, 0))
    compiler_params = pltpu.CompilerParams(dimension_semantics=("parallel",))

    if use_split:
        kernel = functools.partial(_pos_emb_kernel_split, half_dim=half_dim)
        in_specs = [
            pl.BlockSpec((t_rows, 1), lambda i: (i, 0)),
            pl.BlockSpec((1, half_dim), lambda i: (0, 0)),   # resident, no re-DMA
        ]
        operands = (x.reshape(rows_pad, 1), freqs.reshape(1, half_dim))
    else:
        # Constant tables describing the packed output row layout
        # (built once in plain JAX; tiny; resident across grid steps).
        c = jnp.arange(width)
        d = c % dim_out                      # column within one embedding
        k = d % half_dim                     # frequency index
        grp = c // dim_out                   # which packed timestep
        freq_row = jnp.take(freqs, k)                                    # (width,)
        cos_mask = (d >= half_dim).astype(jnp.float32).reshape(1, width)
        freq_blocks = jnp.where(grp[None, :] == jnp.arange(r)[:, None],
                                freq_row[None, :], 0.0).astype(jnp.float32)  # (r, width)
        kernel = _pos_emb_kernel_packed
        in_specs = [
            pl.BlockSpec((t_rows, r), lambda i: (i, 0)),
            pl.BlockSpec((r, width), lambda i: (0, 0)),      # resident
            pl.BlockSpec((1, width), lambda i: (0, 0)),      # resident
        ]
        operands = (x.reshape(rows_pad, r), freq_blocks, cos_mask)

    out = pl.pallas_call(
        kernel,
        out_shape=out_shape,
        grid=(n_tiles,),
        in_specs=in_specs,
        out_specs=out_specs,
        compiler_params=compiler_params,
    )(*operands)

    # (rows_pad, r*dim_out) -> (B_pad, dim_out): rows are contiguous, so this is
    # pure layout plumbing; slice off batch padding.
    return out.reshape(rows_pad * r, dim_out)[:B]


# Plain-XLA reference (also the recommended path for tiny batches / fusion).
def _reference(x, dim):
    half_dim = dim // 2
    emb_scale = math.log(10000.0) / (half_dim - 1)
    freqs = jnp.exp(jnp.arange(half_dim, dtype=jnp.float32) * -emb_scale)
    emb = x.astype(jnp.float32)[:, None] * freqs[None, :]
    return jnp.concatenate([jnp.sin(emb), jnp.cos(emb)], axis=-1)


if __name__ == "__main__":
    root = jax.random.PRNGKey(0)
    k1, k2, k3 = jax.random.split(root, 3)

    # Small shape consistent with the module (diffusion timestep embedding).
    B, dim = 8, 32
    x = jax.random.uniform(k1, (B,), dtype=jnp.float32, minval=0.0, maxval=1000.0)
    out = sinusoidal_pos_emb(x, dim)
    jax.block_until_ready(out)
    ref = _reference(x, dim)
    assert out.shape == (B, dim), out.shape
    assert jnp.allclose(out, ref, atol=1e-5, rtol=1e-5), "small-case mismatch"

    # Larger, non-aligned batch: exercises tiling, padding and the parallel grid.
    B2 = 3000
    x2 = jax.random.uniform(k2, (B2,), dtype=jnp.float32, minval=0.0, maxval=1000.0)
    out2 = sinusoidal_pos_emb(x2, dim, tile_rows=128)
    jax.block_until_ready(out2)
    assert out2.shape == (B2, dim), out2.shape
    assert jnp.allclose(out2, _reference(x2, dim), atol=1e-5, rtol=1e-5), "tiled mismatch"

    # Large even dim: exercises the split (sin|cos slice-store) kernel.
    B3, dim3 = 64, 256
    x3 = jax.random.uniform(k3, (B3,), dtype=jnp.float32, minval=0.0, maxval=1000.0)
    out3 = sinusoidal_pos_emb(x3, dim3)
    jax.block_until_ready(out3)
    assert out3.shape == (B3, dim3), out3.shape
    assert jnp.allclose(out3, _reference(x3, dim3), atol=1e-5, rtol=1e-5), "split-path mismatch"

    # Optional bf16 output (cast-on-store; halves HBM writeback).
    out_bf16 = sinusoidal_pos_emb(x2, dim, tile_rows=128, out_dtype=jnp.bfloat16)
    jax.block_until_ready(out_bf16)
    assert out_bf16.dtype == jnp.bfloat16
    assert jnp.allclose(out_bf16.astype(jnp.float32), _reference(x2, dim),
                        atol=2e-2, rtol=0.0), "bf16 mismatch"

    print("KERNEL_OK")
</pallas_src>

<mosaic_0001>
module attributes {stable_mosaic.version = 11 : i64} {
  func.func @_pos_emb_kernel_packed(%arg0: i32, %arg1: memref<2x4xf32, #tpu.memory_space<vmem>>, %arg2: memref<4x128xf32, #tpu.memory_space<vmem>>, %arg3: memref<1x128xf32, #tpu.memory_space<vmem>>, %arg4: memref<2x128xf32, #tpu.memory_space<vmem>>) attributes {dimension_semantics = [#tpu.dimension_semantics<parallel>], iteration_bounds = array<i64: 1>, scalar_prefetch = 0 : i64, scratch_operands = 0 : i64, tpu.core_type = #tpu.core_type<tc>, window_params = [{transform_indices = @transform_0, window_bounds = array<i64: 2, 4>}, {pipeline_mode = #tpu.pipeline_mode<synchronous>, transform_indices = @transform_1, window_bounds = array<i64: 4, 128>}, {pipeline_mode = #tpu.pipeline_mode<synchronous>, transform_indices = @transform_2, window_bounds = array<i64: 1, 128>}, {transform_indices = @transform_3, window_bounds = array<i64: 2, 128>}]} {
    %c0 = arith.constant 0 : index
    %c0_0 = arith.constant 0 : index
    %0 = vector.load %arg1[%c0, %c0_0] : memref<2x4xf32, #tpu.memory_space<vmem>>, vector<2x4xf32>
    %1 = vector.extract_strided_slice %0 {offsets = [0, 0], sizes = [2, 1], strides = [1, 1]} : vector<2x4xf32> to vector<2x1xf32>
    %c0_1 = arith.constant 0 : index
    %c0_2 = arith.constant 0 : index
    %2 = vector.load %arg2[%c0_1, %c0_2] : memref<4x128xf32, #tpu.memory_space<vmem>>, vector<1x128xf32>
    %3 = vector.broadcast %1 : vector<2x1xf32> to vector<2x128xf32>
    %4 = vector.broadcast %2 : vector<1x128xf32> to vector<2x128xf32>
    %5 = arith.mulf %3, %4 : vector<2x128xf32>
    %6 = vector.extract_strided_slice %0 {offsets = [0, 1], sizes = [2, 1], strides = [1, 1]} : vector<2x4xf32> to vector<2x1xf32>
    %c1 = arith.constant 1 : index
    %c0_3 = arith.constant 0 : index
    %7 = vector.load %arg2[%c1, %c0_3] : memref<4x128xf32, #tpu.memory_space<vmem>>, vector<1x128xf32>
    %8 = vector.broadcast %6 : vector<2x1xf32> to vector<2x128xf32>
    %9 = vector.broadcast %7 : vector<1x128xf32> to vector<2x128xf32>
    %10 = arith.mulf %8, %9 : vector<2x128xf32>
    %11 = arith.addf %5, %10 : vector<2x128xf32>
    %12 = vector.extract_strided_slice %0 {offsets = [0, 2], sizes = [2, 1], strides = [1, 1]} : vector<2x4xf32> to vector<2x1xf32>
    %c2 = arith.constant 2 : index
    %c0_4 = arith.constant 0 : index
    %13 = vector.load %arg2[%c2, %c0_4] : memref<4x128xf32, #tpu.memory_space<vmem>>, vector<1x128xf32>
    %14 = vector.broadcast %12 : vector<2x1xf32> to vector<2x128xf32>
    %15 = vector.broadcast %13 : vector<1x128xf32> to vector<2x128xf32>
    %16 = arith.mulf %14, %15 : vector<2x128xf32>
    %17 = arith.addf %11, %16 : vector<2x128xf32>
    %18 = vector.extract_strided_slice %0 {offsets = [0, 3], sizes = [2, 1], strides = [1, 1]} : vector<2x4xf32> to vector<2x1xf32>
    %c3 = arith.constant 3 : index
    %c0_5 = arith.constant 0 : index
    %19 = vector.load %arg2[%c3, %c0_5] : memref<4x128xf32, #tpu.memory_space<vmem>>, vector<1x128xf32>
    %20 = vector.broadcast %18 : vector<2x1xf32> to vector<2x128xf32>
    %21 = vector.broadcast %19 : vector<1x128xf32> to vector<2x128xf32>
    %22 = arith.mulf %20, %21 : vector<2x128xf32>
    %23 = arith.addf %17, %22 : vector<2x128xf32>
    %c0_6 = arith.constant 0 : index
    %c0_7 = arith.constant 0 : index
    %24 = vector.load %arg3[%c0_6, %c0_7] : memref<1x128xf32, #tpu.memory_space<vmem>>, vector<1x128xf32>
    %cst = arith.constant 1.000000e+00 : f32
    %25 = vector.broadcast %cst : f32 to vector<1x128xf32>
    %26 = arith.cmpf oeq, %24, %25 : vector<1x128xf32>
    %27 = math.cos %23 : vector<2x128xf32>
    %28 = math.sin %23 : vector<2x128xf32>
    %29 = vector.shape_cast %26 : vector<1x128xi1> to vector<1x128xi1>
    %30 = vector.broadcast %29 : vector<1x128xi1> to vector<2x128xi1>
    %31 = arith.select %30, %27, %28 : vector<2x128xi1>, vector<2x128xf32>
    %c0_8 = arith.constant 0 : index
    %c0_9 = arith.constant 0 : index
    %32 = vector.load %arg4[%c0_8, %c0_9] : memref<2x128xf32, #tpu.memory_space<vmem>>, vector<2x128xf32>
    tpu.vector_store %arg4[%c0_8, %c0_9], %31 {strides = array<i32>} : memref<2x128xf32, #tpu.memory_space<vmem>>, vector<2x128xf32>,
    return
  }
  func.func @transform_0(%arg0: i32) -> (i32, i32) {
    %c0_i32 = arith.constant 0 : i32
    %c0_i32_0 = arith.constant 0 : i32
    return %arg0, %c0_i32 : i32, i32
  }
  func.func @transform_1(%arg0: i32) -> (i32, i32) {
    %c0_i32 = arith.constant 0 : i32
    %c0_i32_0 = arith.constant 0 : i32
    %c0_i32_1 = arith.constant 0 : i32
    return %c0_i32, %c0_i32_0 : i32, i32
  }
  func.func @transform_2(%arg0: i32) -> (i32, i32) {
    %c0_i32 = arith.constant 0 : i32
    %c0_i32_0 = arith.constant 0 : i32
    %c0_i32_1 = arith.constant 0 : i32
    return %c0_i32, %c0_i32_0 : i32, i32
  }
  func.func @transform_3(%arg0: i32) -> (i32, i32) {
    %c0_i32 = arith.constant 0 : i32
    %c0_i32_0 = arith.constant 0 : i32
    return %arg0, %c0_i32 : i32, i32
  }
}

</mosaic_0001>

<bundles_post_ra>
// kernel: tpu_custom_call.1
= control target key start
LH: loop header
LB: loop body
LE: loop exit
PB: predicated region body
PF: predicated region fallthrough
CT: control target
= control target key end

     0   :  { %8 = vsyncpa [#allocation3], 0  ;;  %s523_s0 = inlined_call_operand.hbm [shape: f32[2,4], index: 0, kind: input, shape index: {}]   ;;  %s524_s1 = inlined_call_operand.hbm [shape: f32[4,128], index: 1, kind: input, shape index: {}]   ;;  %s525_s2 = inlined_call_operand.vmem [shape: f32[1,128], index: 2, kind: input, shape index: {}]   ;;  %s526_s3 = inlined_call_operand.hbm [shape: f32[2,128], index: 3, kind: output, shape index: {}]  }
   0x1   :  { %9 = vsyncpa [#allocation6], 0 }
   0x2   :  { %10 = vsyncpa [#allocation4], 0  ;;  %s427_s12 = smov [#allocation2]   ;;  %s428_s14 = smov [#allocation5]  }
   0x3   :  { %s17_s13 = sshll.u32 %s427_s12, 4  ;;  %s27_s15 = sshll.u32 %s428_s14, 4  ;;  %s18_s13 = int_to_ptr.vmem [resolvable:$true] %s17_s13  ;;  %s28_s15 = int_to_ptr.vmem [resolvable:$true] %s27_s15 }
   0x4   :  { %s355_s18 = scalar_lea.hbm %s523_s0, 32 }
   0x5   :  { %p356_p0 = scmp.ne.s32.totalorder %s523_s0, %s355_s18  ;;  %p359_p1 = scmp.lt.u32.totalorder %s355_s18, %s523_s0 }
   0x7   :  { %p361_p2 = pnand %p359_p1, %p356_p0 }
   0x9   :  { %364 = shalt.err (!%p361_p2)
}
   0xa   :  { %s365_s23 = scalar_lea.vmem %s18_s13, 32  ;;  %p370_p4 = scmp.lt.s32.totalorder %s18_s13, %s18_s13 }
   0xb   :  { %p366_p3 = scmp.ne.s32.totalorder %s18_s13, %s365_s23  ;;  %p371_p5 = scmp.lt.s32.totalorder %s365_s23, %s365_s23 }
   0xd   :  { %p372_p6 = por %p371_p5, %p370_p4 }
   0xf   :  { %p373_p7 = pnand %p372_p6, %p366_p3 }
  0x11   :  { %376 = shalt.err (!%p373_p7)
}
  0x12   :  { %20 = dma.hbm_to_vmem [thread:$0]  %s523_s0, 32, %s18_s13, [#allocation3]  }
  0x13   :  { %s377_s28 = scalar_lea.hbm %s524_s1, 64 }
  0x14   :  { %p378_p8 = scmp.ne.s32.totalorder %s524_s1, %s377_s28  ;;  %p381_p9 = scmp.lt.u32.totalorder %s377_s28, %s524_s1 }
  0x16   :  { %p383_p10 = pnand %p381_p9, %p378_p8 }
  0x18   :  { %386 = shalt.err (!%p383_p10)
}
  0x19   :  { %s387_s6 = scalar_lea.vmem %s28_s15, 64  ;;  %p392_p12 = scmp.lt.s32.totalorder %s28_s15, %s28_s15 }
  0x1a   :  { %p388_p11 = scmp.ne.s32.totalorder %s28_s15, %s387_s6  ;;  %p393_p13 = scmp.lt.s32.totalorder %s387_s6, %s387_s6 }
  0x1c   :  { %p394_p0 = por %p393_p13, %p392_p12 }
  0x1e   :  { %p395_p1 = pnand %p394_p0, %p388_p11 }
  0x20   :  { %398 = shalt.err (!%p395_p1)
}
  0x21   :  { %30 = dma.hbm_to_vmem [thread:$0]  %s524_s1, 64, %s28_s15, [#allocation6]  }
  0x22   :  { %421 = dma.done.wait [#allocation3], 32  }
  0x23   :  { %422 = vsyncadd [#allocation3], 4294967264 }
  0x24   :  { %423 = dma.done.wait [#allocation6], 64  }
  0x25   :  { %424 = vsyncadd [#allocation6], 4294967232  ;;  %v429_v0 = vmov 0   ;;  %v430_v1 = vmov 2   ;;  %v39_v2 = vld [vmem:[#allocation2] sm:$0x3] }
  0x26   :  { %346 = vset.pattern.permute.xlu0 %v429_v0  ;;  %348 = vset.pattern.permute.xlu1 %v430_v1  ;;  %v431_v3 = vmov 1   ;;  %v432_v4 = vmov 3   ;;  %v317_v7 = vld [vmem:[#allocation5] ss:$0 sm:$0xff]  ;;  %v318_v8 = vld [vmem:[#allocation5 + $0x1] ss:$0 sm:$0xff] }
  0x27   :  { %43 = vperm.xlu0 %346, %v39_v2   ;;  %64 = vperm.xlu1 %348, %v39_v2   ;;  %v319_v9 = vld [vmem:[#allocation5 + $0x2] ss:$0 sm:$0xff]  ;;  %v320_v11 = vld [vmem:[#allocation5 + $0x3] ss:$0 sm:$0xff]  ;;  %v433_v30 = vmov 683565275  }
  0x28   :  { %v434_v32 = vmov 2475754826   ;;  %v435_v35 = vmov 2131351028   ;;  %v436_v38 = vmov 2102212464  }
  0x29   :  { %v437_v41 = vmov 920167782   ;;  %v438_v44 = vmov 1326507024  }
  0x2b   :  { %347 = vset.pattern.permute.xlu0 %v431_v3  ;;  %349 = vset.pattern.permute.xlu1 %v432_v4 }
  0x2c   :  { %53 = vperm.xlu0 %347, %v39_v2   ;;  %75 = vperm.xlu1 %349, %v39_v2  }
  0x30   :  { %350 = vset.pattern.permute.xlu0 %v432_v4 }
  0xa6   :  { %v44_v5 = vpop.permute.xlu0 %43  ;;  %v65_v6 = vpop.permute.xlu1 %64 }
  0xa7   :  { %v50_v13 = vmul.f32 %v317_v7, %v44_v5  ;;  %v71_v15 = vmul.f32 %v319_v9, %v65_v6 }
  0xab   :  { %v54_v10 = vpop.permute.xlu0 %53  ;;  %v76_v12 = vpop.permute.xlu1 %75 }
  0xac   :  { %v60_v14 = vmul.f32 %v318_v8, %v54_v10  ;;  %v82_v17 = vmul.f32 %v320_v11, %v76_v12 }
  0xae   :  { %v61_v16 = vadd.f32 %v60_v14, %v50_v13 }
  0xb0   :  { %v72_v18 = vadd.f32 %v71_v15, %v61_v16 }
  0xb2   :  { %v485_v19 = vadd.f32 %v82_v17, %v72_v18 }
  0xb4   :  { %v89_v20 = vand.u32 2139095040, %v485_v19  ;;  %v86_v24 = vand.u32 2147483647, %v485_v19  ;;  %vm88_vm7 = vcmp.lt.s32.totalorder %v485_v19, 0 }
  0xb6   :  { %v90_v21 = vshrl.u32 %v89_v20, 23  ;;  %v93_v27 = vand.u32 8388607, %v86_v24  ;;  %vm87_vm8 = vcmp.le.f32.partialorder %v86_v24, 0.7853982 }
  0xb8   :  { %v321_v22 = vadd.s32 4294967169, %v90_v21  ;;  %v94_v46 = vor.u32 8388608, %v93_v27 }
  0xba   :  { %v96_v23 = vadd.s32 1, %v321_v22  ;;  %v134_v60 = vshll.u32 %v94_v46, 8 }
  0xbc   :  { %vm97_vm0 = vcmp.gt.s32.totalorder %v96_v23, 0 }
  0xbd   :  { %v98_v25 = vsel %vm97_vm0, %v96_v23, 0 }
  0xbe   :  { %v100_v26 = vand.u32 31, %v98_v25  ;;  %v99_v29 = vshrl.u32 %v98_v25, 5 }
  0xc0   :  { %v101_v28 = vsub.s32 32, %v100_v26  ;;  %v103_v31 = vshll.u32 %v433_v30, %v100_v26  ;;  %v106_v33 = vshll.u32 %v434_v32, %v100_v26  ;;  %v109_v37 = vshll.u32 %v435_v35, %v100_v26 }
  0xc1   :  { %v112_v40 = vshll.u32 %v436_v38, %v100_v26  ;;  %v115_v43 = vshll.u32 %v437_v41, %v100_v26  ;;  %vm118_vm1 = vcmp.lt.s32.totalorder %v99_v29, 1  ;;  %vm121_vm2 = vcmp.lt.s32.totalorder %v99_v29, 4 }
  0xc2   :  { %v104_v34 = vshrl.u32 %v434_v32, %v101_v28  ;;  %v107_v36 = vshrl.u32 %v435_v35, %v101_v28  ;;  %v110_v39 = vshrl.u32 %v436_v38, %v101_v28  ;;  %v113_v42 = vshrl.u32 %v437_v41, %v101_v28 }
  0xc3   :  { %v116_v45 = vshrl.u32 %v438_v44, %v101_v28  ;;  %v102_v55 = vshrl.u32 %v433_v30, %v101_v28  ;;  %vm120_vm3 = vcmp.lt.s32.totalorder %v99_v29, 3  ;;  %vm119_vm4 = vcmp.lt.s32.totalorder %v99_v29, 2 }
  0xc4   :  { %v105_v47 = vor.u32 %v104_v34, %v103_v31  ;;  %v108_v48 = vor.u32 %v107_v36, %v106_v33  ;;  %v111_v49 = vor.u32 %v110_v39, %v109_v37  ;;  %v114_v50 = vor.u32 %v113_v42, %v112_v40  ;;  %v84_v39 = vld [vmem:[%s525_s2] sm:$0x1]  ;;  %s439_s2 = smov [#allocation7]  }
  0xc5   :  { %v117_v51 = vor.u32 %v116_v45, %v115_v43  ;;  %v294_v35 = vlaneseq  ;;  %vm85_vm9 = vcmp.eq.f32.partialorder %v84_v39, 1.0  ;;  %s307_s9 = sshll.u32 %s439_s2, 4  ;;  %s308_s9 = int_to_ptr.vmem [resolvable:$true] %s307_s9 }
  0xc6   :  { %v123_v52 = vsel %vm121_vm2, %v111_v49, 2102212464  ;;  %v126_v53 = vsel %vm118_vm1, %v105_v47, %v108_v48  ;;  %v130_v54 = vsel %vm118_vm1, %v108_v48, %v111_v49  ;;  %v127_v56 = vsel %vm121_vm2, %v114_v50, 920167782  ;;  %s399_s10 = scalar_lea.vmem %s308_s9, 32  ;;  %p404_p3 = scmp.lt.s32.totalorder %s308_s9, %s308_s9 }
  0xc7   :  { %v131_v57 = vsel %vm121_vm2, %v117_v51, 1326507024  ;;  %v128_v58 = vsel %vm120_vm3, %v111_v49, %v127_v56  ;;  %v122_v61 = vsel %vm118_vm1, %v102_v55, %v105_v47  ;;  %v124_v62 = vsel %vm120_vm3, %v108_v48, %v123_v52  ;;  %p400_p2 = scmp.ne.s32.totalorder %s308_s9, %s399_s10  ;;  %p405_p4 = scmp.lt.s32.totalorder %s399_s10, %s399_s10 }
  0xc8   :  { %v132_v59 = vsel %vm120_vm3, %v114_v50, %v131_v57  ;;  %v129_v63 = vsel %vm119_vm4, %v126_v53, %v128_v58  ;;  %v125_v6 = vsel %vm119_vm4, %v122_v61, %v124_v62  ;;  %v295_v41 = vshrl.u32 %v294_v35, 7 }
  0xc9   :  { %v133_v1 = vsel %vm119_vm4, %v130_v54, %v132_v59  ;;  %v494_v4 = vmul.u32.u64.low %v134_v60, %v129_v63  ;;  %v495_v5 = vmul.u32.u64.high %v134_v60, %v129_v63, %v494_v4  ;;  %v141_v8 = vmul.u32 %v134_v60, %v125_v6  ;;  %p406_p5 = por %p405_p4, %p404_p3 }
  0xca   :  { %v491_v2 = vmul.u32.u64.low %v134_v60, %v133_v1  ;;  %v492_v3 = vmul.u32.u64.high %v134_v60, %v133_v1, %v491_v2  ;;  %v296_v43 = vsub.s32 0, %v295_v41  ;;  %v293_v45 = vsel %vm85_vm9, 1, %v429_v0 }
  0xcb   :  { %v144_v7 = vadd.s32 1, %v495_v5  ;;  %vm178_vm1 = vweird.f32 %v485_v19  ;;  %p407_p6 = pnand %p406_p5, %p400_p2 }
  0xcc   :  { %vm143_vm5 = vc.u32 %v492_v3, %v494_v4  ;;  %v142_v21 = vadd.s32 %v494_v4, %v492_v3  ;;  %v297_v46 = vrot.slane %v293_v45, %v296_v43 }
  0xcd   :  { %v145_v9 = vsel %vm143_vm5, %v144_v7, %v495_v5 }
  0xce   :  { %v146_v10 = vadd.s32 %v145_v9, %v141_v8  ;;  %vm298_vm10 = vcmp.eq.s32.totalorder %v297_v46, 1 }
  0xd0   :  { %v147_v11 = vadd.s32 536870912, %v146_v10 }
  0xd2   :  { %v148_v12 = vshrl.u32 %v147_v11, 30 }
  0xd4   :  { %v149_v13 = vshll.u32 %v148_v12, 30  ;;  %v172_v34 = vsub.s32 4, %v148_v12 }
  0xd6   :  { %v150_v14 = vsub.s32 %v146_v10, %v149_v13  ;;  %v173_v38 = vsel %vm88_vm7, %v172_v34, %v148_v12 }
  0xd7   :  { %v175_v42 = vsel %vm87_vm8, 0, %v173_v38 }
  0xd8   :  { %v152_v15 = vsub.s32 0, %v150_v14  ;;  %v282_v44 = vadd.s32 3, %v175_v42  ;;  %v179_v47 = vand.u32 3, %v175_v42 }
  0xda   :  { %v322_v16 = vmin.u32 %v152_v15, %v150_v14  ;;  %v283_v48 = vand.u32 3, %v282_v44  ;;  %vm184_vm11 = vcmp.eq.s32.totalorder %v179_v47, 2  ;;  %vm181_vm13 = vcmp.eq.s32.totalorder %v179_v47, 0 }
  0xdb   :  { %vm180_vm15 = vcmp.lt.s32.totalorder %v179_v47, 2 }
  0xdc   :  { %v154_v17 = vclz %v322_v16  ;;  %vm288_vm12 = vcmp.eq.s32.totalorder %v283_v48, 2  ;;  %vm285_vm14 = vcmp.eq.s32.totalorder %v283_v48, 0  ;;  %vm284_vm0 = vcmp.lt.s32.totalorder %v283_v48, 2 }
  0xde   :  { %v323_v18 = vadd.s32 4294967294, %v154_v17 }
  0xe0   :  { %vm324_vm6 = vcmp.lt.s32.totalorder %v323_v18, 0 }
  0xe1   :  { %v157_v20 = vsel %vm324_vm6, 0, %v323_v18 }
  0xe2   :  { %v158_v22 = vsub.s32 32, %v157_v20  ;;  %v162_v23 = vsub.s32 4294967266, %v157_v20  ;;  %v159_v25 = vshll.u32 %v150_v14, %v157_v20 }
  0xe4   :  { %v160_v26 = vshrl.u32 %v142_v21, %v158_v22  ;;  %v163_v27 = vadd.s32 127, %v162_v23 }
  0xe6   :  { %v161_v28 = vor.u32 %v160_v26, %v159_v25  ;;  %v164_v29 = vshll.u32 %v163_v27, 23 }
  0xe8   :  { %v165_v30 = vor.u32 4788187, %v164_v29  ;;  %v168_v32 = vcvt.s32.f32 %v161_v28 }
  0xea   :  { %v166_v31 = vand.u32 2147483647, %v165_v30 }
  0xec   :  { %v169_v33 = vmul.f32 %v168_v32, %v166_v31 }
  0xee   :  { %v170_v36 = vxor.u32 2147483648, %v169_v33 }
  0xf0   :  { %v171_v37 = vsel %vm88_vm7, %v170_v36, %v169_v33 }
  0xf1   :  { %v174_v40 = vsel %vm87_vm8, %v485_v19, %v171_v37 }
  0xf2   :  { %351 = vcosq.f32 %v174_v40 }
  0xf3   :  { %353 = vsinq.f32 %v174_v40 }
  0xfc   :  { %v352_v24 = vpop.eup %351 }
  0xfd   :  { %v354_v49 = vpop.eup %353  ;;  %v185_v50 = vxor.u32 2147483648, %v352_v24 }
  0xfe   :  { %v182_v51 = vxor.u32 2147483648, %v354_v49 }
  0xff   :  { %v186_v52 = vsel %vm184_vm11, %v185_v50, %v354_v49  ;;  %v290_v53 = vsel %vm288_vm12, %v185_v50, %v354_v49 }
 0x100   :  { %v183_v54 = vsel %vm181_vm13, %v352_v24, %v182_v51  ;;  %v287_v0 = vsel %vm285_vm14, %v352_v24, %v182_v51 }
 0x101   :  { %v187_v55 = vsel %vm180_vm15, %v183_v54, %v186_v52  ;;  %v291_v56 = vsel %vm284_vm0, %v287_v0, %v290_v53 }
 0x102   :  { %v188_v57 = vsel %vm178_vm1, nan, %v187_v55  ;;  %v292_v58 = vsel %vm178_vm1, nan, %v291_v56 }
 0x103   :  { %v299_v59 = vsel %vm298_vm10, %v188_v57, %v292_v58 }
 0x104   :  { %300 = vst [vmem:[#allocation7] sm:$0x3] %v299_v59 }
 0x105   :  { %410 = shalt.err (!%p407_p6)
}
 0x106   :  { %s411_s13 = scalar_lea.hbm %s526_s3, 32 }
 0x107   :  { %p412_p7 = scmp.ne.s32.totalorder %s526_s3, %s411_s13  ;;  %p415_p8 = scmp.lt.u32.totalorder %s411_s13, %s526_s3 }
 0x109   :  { %p417_p9 = pnand %p415_p8, %p412_p7 }
 0x10b   :  { %420 = shalt.err (!%p417_p9)
}
 0x10c   :  { %310 = dma.vmem_to_hbm [thread:$0]  %s308_s9, 32, %s526_s3, [#allocation4]  }
 0x10d   :  { %425 = dma.done.wait [#allocation4], 32  }
 0x10e   :  { %426 = vsyncadd [#allocation4], 4294967264 }
 0x10f   :  { %314 = vsyncpa [#allocation3], 1 }
 0x110   :  { %315 = vsyncpa [#allocation6], 1 }
 0x111   :  { %316 = vsyncpa [#allocation4], 1 }

</bundles_post_ra>
